<compile_context>
chip_gen: v5e
topology: v5e:2x2
jax: 0.10.0
libtpu: 0.0.40
codegen_flags: <defaults>
</compile_context>

<pallas_src>
import jax
import jax.numpy as jnp
from jax.experimental import pallas as pl
from jax.experimental.pallas import tpu as pltpu

_LANES = 128                      # vreg lane width
_DEFAULT_ROW_TILE = 4096          # 4096 x 128 f32 = 2 MiB block (1 MiB for bf16)
_PALLAS_MIN_ELEMENTS = 1 << 18    # below ~256K elems fused XLA wins on launch cost


def _round_up(x, m):
    return -(-x // m) * m


def _sublane_multiple(dtype):
    """Natural sublane packing: 8 for 4-byte, 16 for 2-byte, 32 for 1-byte dtypes."""
    return max(8, 32 // jnp.dtype(dtype).itemsize)


def _linear11_kernel(w_ref, b_ref, x_ref, o_ref):
    """out = x * w + b, one VPU multiply-add per vreg (no MXU).

    w_ref, b_ref : (1,) float32 scalars in SMEM.
    x_ref, o_ref : (row_tile, 128) VMEM blocks, batch packed along the lane axis.
    """
    dt = x_ref.dtype
    w = w_ref[0].astype(dt)
    b = b_ref[0].astype(dt)
    o_ref[...] = (x_ref[...] * w + b).astype(o_ref.dtype)


def net_forward_pallas(x, weight, bias, *, row_tile=_DEFAULT_ROW_TILE):
    """Pallas path for Net.forward (nn.Linear(1, 1)): y = x @ W.T + b."""
    batch, in_f = x.shape
    out_f, w_in = weight.shape
    assert in_f == 1 and out_f == 1 and w_in == 1, "Net uses nn.Linear(1, 1)"

    n = batch                                      # total elements (in_f == out_f == 1)
    dt = x.dtype
    itemsize = jnp.dtype(dt).itemsize
    sub = _sublane_multiple(dt)

    if n % _LANES == 0:
        # Zero-copy path: contiguous reshape, no pad, no output slice.
        rows = n // _LANES
        x2d = x.reshape(rows, _LANES)
        tail_padded = False
    else:
        # Lane-unaligned tail: pad (copies x). The dispatcher below routes these
        # sizes to fused XLA instead; this branch is kept only for completeness.
        # TODO(synk): a pad-free tail would need a masked-lane edge block.
        rows = pl.cdiv(n, _LANES)
        x2d = jnp.pad(x.reshape(-1), (0, rows * _LANES - n)).reshape(rows, _LANES)
        tail_padded = True

    # Tile selection: dtype-aligned, capped by row_tile, and >= 2 grid steps
    # whenever there is more than one min-tile of rows (v7x megacore sharding).
    row_tile = max(sub, (row_tile // sub) * sub)
    if rows <= sub:
        tile = rows                                # single block == full array dims
    else:
        tile = min(row_tile, _round_up(pl.cdiv(rows, 2), sub))
    grid = (pl.cdiv(rows, tile),)                  # partial last block is fine

    w_s = weight.reshape(1).astype(jnp.float32)
    b_s = bias.reshape(1).astype(jnp.float32)

    out2d = pl.pallas_call(
        _linear11_kernel,
        out_shape=jax.ShapeDtypeStruct((rows, _LANES), dt),
        grid=grid,
        in_specs=[
            pl.BlockSpec(memory_space=pltpu.MemorySpace.SMEM),   # weight scalar
            pl.BlockSpec(memory_space=pltpu.MemorySpace.SMEM),   # bias scalar
            pl.BlockSpec((tile, _LANES), lambda i: (i, 0)),      # x tile
        ],
        out_specs=pl.BlockSpec((tile, _LANES), lambda i: (i, 0)),
        compiler_params=pltpu.CompilerParams(
            dimension_semantics=("parallel",)),                  # megacore-shardable
        cost_estimate=pl.CostEstimate(
            flops=2 * n,
            transcendentals=0,
            bytes_accessed=2 * n * itemsize + 8),
    )(w_s, b_s, x2d)

    if tail_padded:
        return out2d.reshape(-1)[:n].reshape(batch, out_f)
    return out2d.reshape(batch, out_f)             # contiguous reshape: no copy


def net_forward(x, weight, bias):
    """Net.forward. Fused XLA for tiny or lane-unaligned batches (it is already
    at the HBM roofline with zero wrapper copies); Pallas kernel otherwise."""
    n = x.shape[0] * x.shape[1]
    if n < _PALLAS_MIN_ELEMENTS or n % _LANES != 0:
        return (x * weight[0, 0] + bias[0]).astype(x.dtype)
    return net_forward_pallas(x, weight, bias)


def init_params(key):
    """torch.nn.Linear(1, 1) default init: U(-1/sqrt(in_f), 1/sqrt(in_f)) = U(-1, 1)."""
    k_w, k_b = jax.random.split(key)
    bound = 1.0  # 1/sqrt(1)
    weight = jax.random.uniform(k_w, (1, 1), jnp.float32, -bound, bound)
    bias = jax.random.uniform(k_b, (1,), jnp.float32, -bound, bound)
    return weight, bias


if __name__ == "__main__":
    key = jax.random.PRNGKey(0)
    k_param, k1, k2, k3, k4 = jax.random.split(key, 5)
    weight, bias = init_params(k_param)

    # 1) Lane-aligned, single (8,128) block, zero-copy wrapper path.
    x_a = jax.random.normal(k1, (1024, 1), dtype=jnp.float32)
    out_a = jax.block_until_ready(net_forward_pallas(x_a, weight, bias))
    ref_a = x_a @ weight.T + bias
    assert out_a.shape == (1024, 1)
    assert jnp.allclose(out_a, ref_a, atol=1e-6)

    # 2) Multi-step grid with a caller-supplied small tile: rows=16, tile=8, grid=(2,).
    x_b = jax.random.normal(k2, (2048, 1), dtype=jnp.float32)
    ref_b = x_b @ weight.T + bias
    out_b = jax.block_until_ready(net_forward_pallas(x_b, weight, bias, row_tile=8))
    assert jnp.allclose(out_b, ref_b, atol=1e-6)

    # 3) Default tile selection with >=2 grid steps: rows=64 -> tile=32, grid=(2,).
    x_c = jax.random.normal(k3, (8192, 1), dtype=jnp.float32)
    ref_c = x_c @ weight.T + bias
    out_c = jax.block_until_ready(net_forward_pallas(x_c, weight, bias))
    assert jnp.allclose(out_c, ref_c, atol=1e-6)

    # 4) Lane-unaligned batch: pad path inside net_forward_pallas still correct.
    x_d = jax.random.normal(k4, (130, 1), dtype=jnp.float32)
    ref_d = x_d @ weight.T + bias
    out_d = jax.block_until_ready(net_forward_pallas(x_d, weight, bias))
    assert out_d.shape == (130, 1)
    assert jnp.allclose(out_d, ref_d, atol=1e-6)

    # 5) Dispatcher fast path (fused XLA for tiny batches) agrees as well.
    x_small = x_d[:8]
    assert jnp.allclose(net_forward(x_small, weight, bias),
                        x_small @ weight.T + bias, atol=1e-6)

    print("KERNEL_OK")
</pallas_src>

<mosaic_0001>
module attributes {stable_mosaic.version = 11 : i64} {
  func.func @_linear11_kernel(%arg0: i32, %arg1: memref<1xf32, #tpu.memory_space<smem>>, %arg2: memref<1xf32, #tpu.memory_space<smem>>, %arg3: memref<8x128xf32, #tpu.memory_space<vmem>>, %arg4: memref<8x128xf32, #tpu.memory_space<vmem>>) attributes {dimension_semantics = [#tpu.dimension_semantics<parallel>], iteration_bounds = array<i64: 1>, scalar_prefetch = 0 : i64, scratch_operands = 0 : i64, tpu.core_type = #tpu.core_type<tc>, window_params = [{transform_indices = @transform_0, window_bounds = array<i64: 1>}, {transform_indices = @transform_1, window_bounds = array<i64: 1>}, {transform_indices = @transform_2, window_bounds = array<i64: 8, 128>}, {transform_indices = @transform_3, window_bounds = array<i64: 8, 128>}]} {
    %c0 = arith.constant 0 : index
    %0 = memref.load %arg1[%c0] : memref<1xf32, #tpu.memory_space<smem>>
    %c0_0 = arith.constant 0 : index
    %1 = memref.load %arg2[%c0_0] : memref<1xf32, #tpu.memory_space<smem>>
    %c0_1 = arith.constant 0 : index
    %c0_2 = arith.constant 0 : index
    %2 = vector.load %arg3[%c0_1, %c0_2] : memref<8x128xf32, #tpu.memory_space<vmem>>, vector<8x128xf32>
    %3 = vector.broadcast %0 : f32 to vector<8x128xf32>
    %4 = arith.mulf %2, %3 : vector<8x128xf32>
    %5 = vector.broadcast %1 : f32 to vector<8x128xf32>
    %6 = arith.addf %4, %5 : vector<8x128xf32>
    %c0_3 = arith.constant 0 : index
    %c0_4 = arith.constant 0 : index
    %7 = vector.load %arg4[%c0_3, %c0_4] : memref<8x128xf32, #tpu.memory_space<vmem>>, vector<8x128xf32>
    tpu.vector_store %arg4[%c0_3, %c0_4], %6 {strides = array<i32>} : memref<8x128xf32, #tpu.memory_space<vmem>>, vector<8x128xf32>,
    return
  }
  func.func @transform_0(%arg0: i32) -> i32 {
    %c0_i32 = arith.constant 0 : i32
    %c0_i32_0 = arith.constant 0 : i32
    return %c0_i32 : i32
  }
  func.func @transform_1(%arg0: i32) -> i32 {
    %c0_i32 = arith.constant 0 : i32
    %c0_i32_0 = arith.constant 0 : i32
    return %c0_i32 : i32
  }
  func.func @transform_2(%arg0: i32) -> (i32, i32) {
    %c0_i32 = arith.constant 0 : i32
    %c0_i32_0 = arith.constant 0 : i32
    return %arg0, %c0_i32 : i32, i32
  }
  func.func @transform_3(%arg0: i32) -> (i32, i32) {
    %c0_i32 = arith.constant 0 : i32
    %c0_i32_0 = arith.constant 0 : i32
    return %arg0, %c0_i32 : i32, i32
  }
}

</mosaic_0001>

<bundles_post_ra>
// kernel: tpu_custom_call.1
= control target key start
LH: loop header
LB: loop body
LE: loop exit
PB: predicated region body
PF: predicated region fallthrough
CT: control target
= control target key end

     0   :  { %10 = vsyncpa [#allocation5], 0  ;;  %s144_s0 = inlined_call_operand.<no memory space> [shape: f32[1], index: 0, kind: input, shape index: {}]   ;;  %s145_s1 = inlined_call_operand.<no memory space> [shape: f32[1], index: 1, kind: input, shape index: {}]   ;;  %s146_s2 = inlined_call_operand.hbm [shape: f32[8,128], index: 2, kind: input, shape index: {}]   ;;  %s147_s3 = inlined_call_operand.hbm [shape: f32[8,128], index: 3, kind: output, shape index: {}]  }
   0x1   :  { %11 = vsyncpa [#allocation6], 0  ;;  %s21_s14 = sshll.u32 %s146_s2, 4  ;;  %s110_s15 = smov [#allocation4]   ;;  %s22_s14 = int_to_ptr.hbm [resolvable:$true] %s21_s14 }
   0x2   :  { %s23_s16 = sshll.u32 %s110_s15, 4  ;;  %s24_s16 = int_to_ptr.vmem [resolvable:$true] %s23_s16 }
   0x3   :  { %26 = dma.hbm_to_vmem [thread:$0]  %s22_s14, 128, %s24_s16, [#allocation5]  }
   0x4   :  { %106 = dma.done.wait [#allocation5], 128  }
   0x5   :  { %107 = vsyncadd [#allocation5], 4294967168  ;;  %v34_v0 = vstv %s144_s0  ;;  %v33_v1 = vld [vmem:[#allocation4] sm:$0xff]  ;;  %v36_v2 = vstv %s145_s1  ;;  %s111_s21 = smov [#allocation7]   ;;  %s46_s24 = sshll.u32 %s147_s3, 4  ;;  %s47_s24 = int_to_ptr.hbm [resolvable:$true] %s46_s24 }
   0x6   :  { %s44_s22 = sshll.u32 %s111_s21, 4  ;;  %v35_v3 = vmul.f32 %v34_v0, %v33_v1  ;;  %s45_s22 = int_to_ptr.vmem [resolvable:$true] %s44_s22 }
   0x8   :  { %v37_v4 = vadd.f32 %v36_v2, %v35_v3 }
   0xa   :  { %38 = vst [vmem:[#allocation7] sm:$0xff] %v37_v4 }
   0xb   :  { %49 = dma.vmem_to_hbm [thread:$0]  %s45_s22, 128, %s47_s24, [#allocation6]  }
   0xc   :  { %108 = dma.done.wait [#allocation6], 128  }
   0xd   :  { %109 = vsyncadd [#allocation6], 4294967168 }
   0xe   :  { %54 = vsyncpa [#allocation5], 1 }
   0xf   :  { %55 = vsyncpa [#allocation6], 1 }

</bundles_post_ra>
